<compile_context>
chip_gen: v7x
topology: tpu7x:2x2x1
jax: 0.10.0
libtpu: 0.0.40
codegen_flags: <defaults>
</compile_context>

<pallas_src>
import jax
import jax.numpy as jnp
from jax.experimental import pallas as pl
from jax.experimental.pallas import tpu as pltpu


def block_unpool_kernel(x_ref, a_ref, c_ref, o_ref):
    # x_ref: (1, C_in, T)    a_ref: (4*C_out, C_in)    c_ref: (4*C_out, 1)
    # o_ref: (1, 4*C_out, T)
    x = x_ref[0]                                               # (C_in, T)
    o = jnp.dot(a_ref[...], x, preferred_element_type=jnp.float32)
    o_ref[0] = (o + c_ref[...]).astype(o_ref.dtype)


def _pick_spatial_tile(hw, c_in, c_out, budget_bytes=2 << 20):
    """Largest multiple-of-128 divisor of H*W whose (x + out) tile fits the budget.

    budget_bytes is per pipeline buffer; with default double-buffering the
    steady-state VMEM use is ~2x this plus the (tiny) fused weights, which stays
    under the scoped-VMEM defaults on v5e (16 MiB) and v6e/v7x (32 MiB).
    """
    if hw % 128 != 0:
        return hw                                   # small/ragged: one full block
    bytes_per_col = 4 * (c_in + 4 * c_out)          # f32 input col + output col
    cap = max(128, (budget_bytes // bytes_per_col) // 128 * 128)
    t = min(cap, hw)
    while hw % t:
        t -= 128
    return t


def block_unpool(x, w1, b1, wt, b2, w3, b3):
    """BlockUnpool forward.

    x : (N, C_in, H, W)
    w1: (C_in, C_in, 1, 1),  b1: (C_in,)    -- Conv2d(C_in, C_in, 1)
    wt: (C_in, C_out, 2, 2), b2: (C_out,)   -- ConvTranspose2d(C_in, C_out, 2, 2)
    w3: (C_out, C_out, 1, 1), b3: (C_out,)  -- Conv2d(C_out, C_out, 1)
    returns (N, C_out, 2H, 2W)
    """
    n, c_in, h, w = x.shape
    c_out = wt.shape[1]
    hw = h * w

    # ---- trace-time weight fusion (O(C^3), independent of N/H/W) ----
    w1m = w1.reshape(c_in, c_in)
    w3m = w3.reshape(c_out, c_out)
    wt_t = jnp.transpose(wt, (2, 3, 1, 0))                       # (2, 2, C_out, C_in)
    a = jnp.einsum('pq,klqi,ij->klpj', w3m, wt_t, w1m)           # (2, 2, C_out, C_in)
    c = jnp.einsum('klqi,i->klq', wt_t, b1) + b2[None, None, :]
    c = jnp.einsum('pq,klq->klp', w3m, c) + b3[None, None, :]    # (2, 2, C_out)
    a_flat = a.reshape(4 * c_out, c_in).astype(jnp.float32)
    c_flat = c.reshape(4 * c_out, 1).astype(jnp.float32)

    x_flat = x.reshape(n, c_in, hw)                              # NCHW view, free

    t = _pick_spatial_tile(hw, c_in, c_out)
    grid = (n, hw // t)

    out = pl.pallas_call(
        block_unpool_kernel,
        out_shape=jax.ShapeDtypeStruct((n, 4 * c_out, hw), x.dtype),
        grid_spec=pltpu.PrefetchScalarGridSpec(
            num_scalar_prefetch=0,
            grid=grid,
            in_specs=[
                # activation: one image, all channels, one lane-dense spatial tile
                pl.BlockSpec((1, c_in, t), lambda b, s: (b, 0, s)),
                # fused weights / bias: constant block index -> fetched once, stay resident
                pl.BlockSpec((4 * c_out, c_in), lambda b, s: (0, 0)),
                pl.BlockSpec((4 * c_out, 1), lambda b, s: (0, 0)),
            ],
            out_specs=pl.BlockSpec((1, 4 * c_out, t), lambda b, s: (b, 0, s)),
        ),
        compiler_params=pltpu.CompilerParams(
            dimension_semantics=("parallel", "parallel"),   # no reduction axis
            vmem_limit_bytes=32 * 1024 * 1024,
        ),
    )(x_flat, a_flat, c_flat)

    # (N, kh, kw, C_out, H, W) -> (N, C_out, H, kh, W, kw) -> (N, C_out, 2H, 2W)
    out = out.reshape(n, 2, 2, c_out, h, w)
    return jnp.transpose(out, (0, 3, 4, 1, 5, 2)).reshape(n, c_out, 2 * h, 2 * w)


def block_unpool_ref(x, w1, b1, wt, b2, w3, b3):
    """Pure-JAX staged reference matching the PyTorch forward."""
    n, c_in, h, w = x.shape
    c_out = wt.shape[1]
    y1 = jnp.einsum('oc,nchw->nohw', w1.reshape(c_in, c_in), x)
    y1 = y1 + b1[None, :, None, None]
    y2 = jnp.einsum('iokl,nihw->noklhw', wt, y1)                 # (n, C_out, 2, 2, h, w)
    y2 = y2.transpose(0, 1, 4, 2, 5, 3).reshape(n, c_out, 2 * h, 2 * w)
    y2 = y2 + b2[None, :, None, None]
    y3 = jnp.einsum('oc,nchw->nohw', w3.reshape(c_out, c_out), y2)
    return y3 + b3[None, :, None, None]


if __name__ == "__main__":
    N, C_IN, C_OUT, H, W = 2, 4, 8, 16, 16

    key = jax.random.PRNGKey(0)
    kx, k1, kb1, kt, kb2, k3, kb3 = jax.random.split(key, 7)

    x = jax.random.normal(kx, (N, C_IN, H, W), dtype=jnp.float32)
    w1 = jax.random.normal(k1, (C_IN, C_IN, 1, 1), dtype=jnp.float32) / jnp.sqrt(C_IN)
    b1 = jax.random.normal(kb1, (C_IN,), dtype=jnp.float32) * 0.1
    wt = jax.random.normal(kt, (C_IN, C_OUT, 2, 2), dtype=jnp.float32) / jnp.sqrt(4.0 * C_IN)
    b2 = jax.random.normal(kb2, (C_OUT,), dtype=jnp.float32) * 0.1
    w3 = jax.random.normal(k3, (C_OUT, C_OUT, 1, 1), dtype=jnp.float32) / jnp.sqrt(C_OUT)
    b3 = jax.random.normal(kb3, (C_OUT,), dtype=jnp.float32) * 0.1

    fn = jax.jit(block_unpool)
    out = jax.block_until_ready(fn(x, w1, b1, wt, b2, w3, b3))

    ref = block_unpool_ref(x, w1, b1, wt, b2, w3, b3)
    assert out.shape == (N, C_OUT, 2 * H, 2 * W), out.shape
    max_err = float(jnp.max(jnp.abs(out - ref)))
    assert jnp.allclose(out, ref, atol=1e-4, rtol=1e-4), max_err

    print("KERNEL_OK")
</pallas_src>

<mosaic_0001>
module attributes {stable_mosaic.version = 11 : i64} {
  func.func @block_unpool_kernel(%arg0: i32, %arg1: i32, %arg2: memref<1x4x256xf32, #tpu.memory_space<vmem>>, %arg3: memref<32x4xf32, #tpu.memory_space<vmem>>, %arg4: memref<32x1xf32, #tpu.memory_space<vmem>>, %arg5: memref<1x32x256xf32, #tpu.memory_space<vmem>>) attributes {dimension_semantics = [#tpu.dimension_semantics<parallel>, #tpu.dimension_semantics<parallel>], iteration_bounds = array<i64: 2, 1>, scalar_prefetch = 0 : i64, scratch_operands = 0 : i64, tpu.core_type = #tpu.core_type<tc>, window_params = [{transform_indices = @transform_0, window_bounds = array<i64: 1, 4, 256>}, {pipeline_mode = #tpu.pipeline_mode<synchronous>, transform_indices = @transform_1, window_bounds = array<i64: 32, 4>}, {pipeline_mode = #tpu.pipeline_mode<synchronous>, transform_indices = @transform_2, window_bounds = array<i64: 32, 1>}, {transform_indices = @transform_3, window_bounds = array<i64: 1, 32, 256>}]} {
    %c0 = arith.constant 0 : index
    %c0_0 = arith.constant 0 : index
    %c0_1 = arith.constant 0 : index
    %0 = vector.load %arg2[%c0, %c0_0, %c0_1] : memref<1x4x256xf32, #tpu.memory_space<vmem>>, vector<1x4x256xf32>
    %1 = vector.shape_cast %0 : vector<1x4x256xf32> to vector<4x256xf32>
    %c0_2 = arith.constant 0 : index
    %c0_3 = arith.constant 0 : index
    %2 = vector.load %arg3[%c0_2, %c0_3] : memref<32x4xf32, #tpu.memory_space<vmem>>, vector<32x4xf32>
    %cst = arith.constant dense<0.000000e+00> : vector<32x256xf32>
    %3 = tpu.matmul %2, %1, %cst {dimension_numbers = #tpu.dot_dimension_numbers<[1], [0], [0], [1], [0, 0, 1, 1], [], []>} : vector<32x4xf32>, vector<4x256xf32>, vector<32x256xf32> -> vector<32x256xf32>
    %c0_4 = arith.constant 0 : index
    %c0_5 = arith.constant 0 : index
    %4 = vector.load %arg4[%c0_4, %c0_5] : memref<32x1xf32, #tpu.memory_space<vmem>>, vector<32x1xf32>
    %5 = vector.broadcast %4 : vector<32x1xf32> to vector<32x256xf32>
    %6 = arith.addf %3, %5 : vector<32x256xf32>
    %c0_6 = arith.constant 0 : index
    %c0_7 = arith.constant 0 : index
    %c0_8 = arith.constant 0 : index
    %7 = vector.load %arg5[%c0_6, %c0_7, %c0_8] : memref<1x32x256xf32, #tpu.memory_space<vmem>>, vector<1x32x256xf32>
    %8 = vector.shape_cast %7 : vector<1x32x256xf32> to vector<32x256xf32>
    %9 = vector.shape_cast %6 : vector<32x256xf32> to vector<1x32x256xf32>
    tpu.vector_store %arg5[%c0_6, %c0_7, %c0_8], %9 {strides = array<i32>} : memref<1x32x256xf32, #tpu.memory_space<vmem>>, vector<1x32x256xf32>,
    return
  }
  func.func @transform_0(%arg0: i32, %arg1: i32) -> (i32, i32, i32) {
    %c0_i32 = arith.constant 0 : i32
    %c0_i32_0 = arith.constant 0 : i32
    return %arg0, %c0_i32, %arg1 : i32, i32, i32
  }
  func.func @transform_1(%arg0: i32, %arg1: i32) -> (i32, i32) {
    %c0_i32 = arith.constant 0 : i32
    %c0_i32_0 = arith.constant 0 : i32
    %c0_i32_1 = arith.constant 0 : i32
    return %c0_i32, %c0_i32_0 : i32, i32
  }
  func.func @transform_2(%arg0: i32, %arg1: i32) -> (i32, i32) {
    %c0_i32 = arith.constant 0 : i32
    %c0_i32_0 = arith.constant 0 : i32
    %c0_i32_1 = arith.constant 0 : i32
    return %c0_i32, %c0_i32_0 : i32, i32
  }
  func.func @transform_3(%arg0: i32, %arg1: i32) -> (i32, i32, i32) {
    %c0_i32 = arith.constant 0 : i32
    %c0_i32_0 = arith.constant 0 : i32
    return %arg0, %c0_i32, %arg1 : i32, i32, i32
  }
}

</mosaic_0001>

<bundles_post_ra>
// kernel: block_unpool.1
= control target key start
LH: loop header
LB: loop body
LE: loop exit
PB: predicated region body
PF: predicated region fallthrough
CT: control target
= control target key end

     0   :  { %s539_s12 = smov 0   ;;  %s541_s13 = smov 0   ;;  %s600_s0 = inlined_call_operand.vmem [shape: f32[2,4,256], index: 0, kind: input, shape index: {}]   ;;  %s601_s1 = inlined_call_operand.vmem [shape: f32[32,4], index: 1, kind: input, shape index: {}]   ;;  %s602_s2 = inlined_call_operand.vmem [shape: f32[32,1], index: 2, kind: input, shape index: {}]   ;;  %s603_s3 = inlined_call_operand.vmem [shape: f32[2,32,256], index: 3, kind: output, shape index: {}]  }
   0x1   :  { %s543_s14 = smov 0  }
   0x2 LB: > { %s25_s15 = sadd.s32 1, %s511_s13  ;;  %p447_p0 = scmp.ge.s32.totalorder %s515_s14, 1  ;;  %s515_s14 = sphi %s543_s14, %s13_s14   ;;  %s511_s13 = sphi %s541_s13, %s605_s13   ;;  %s507_s12 = sphi %s539_s12, %s604_s12  }
   0x3   : > { %p27_p1 = scmp.ge.s32.totalorder %s25_s15, 2  ;;  %p158_p2 = scmp.lt.s32.totalorder %s515_s14, 3 }
   0x5   : > { %s607_s15 = smov (%p27_p1, %s25_s15), 0  ;;  %p159_p3 = pnand %p447_p0, %p158_p2 }
   0x6   : > { %p191_p4 = scmp.lt.s32.totalorder (!%p159_p3), %s507_s12, 1  ;;  %v517_v0 = vmov (!%p159_p3), 0.0   ;;  %v217_v1 = vld [vmem:[%s602_s2 + $0x10] sm:$0xff] (!%p159_p3)  ;;  %v518_v2 = vmov (!%p159_p3), 0   ;;  %v215_v3 = vld [vmem:[%s602_s2] sm:$0xff] (!%p159_p3)  ;;  %v218_v4 = vld [vmem:[%s602_s2 + $0x18] sm:$0xff] (!%p159_p3) }
   0x7   : > { %162 = sbr.rel (%p159_p3) target bundleno = 242 (0xf2), region = 32  ;;  %323 = vmatprep.mubr.f32.mxu0 (!%p159_p3), %v517_v0  ;;  %335 = vmatprep.mubr.f32.mxu1 (!%p159_p3), %v517_v0  ;;  %v216_v5 = vld [vmem:[%s602_s2 + $0x8] sm:$0xff] (!%p159_p3)  ;;  %vm254_vm0 = vcmask (!%p159_p3), 1043456   ;;  %v211_v8 = vld [vmem:[%s601_s1] sm:$0xff] (!%p159_p3)  ;;  %vm241_vm1 = vcmask (!%p159_p3), 31744   ;;  %v213_v9 = vld [vmem:[%s601_s1 + $0x10] sm:$0xff] (!%p159_p3) }
   0x8   : > { %491 = vset.pattern.permute.xlu1 (!%p159_p3), %v518_v2  ;;  %490 = vset.pattern.permute.xlu0 (!%p159_p3), %v518_v2  ;;  %v212_v10 = vld [vmem:[%s601_s1 + $0x8] sm:$0xff] (!%p159_p3)  ;;  %v214_v11 = vld [vmem:[%s601_s1 + $0x18] sm:$0xff] (!%p159_p3) }
   0x9   : > { %231 = vperm.xlu1 (!%p159_p3), %491, %v217_v1   ;;  %221 = vperm.xlu0 (!%p159_p3), %490, %v215_v3  }
   0xd   : > { %236 = vperm.xlu1 (!%p159_p3), %491, %v218_v4   ;;  %226 = vperm.xlu0 (!%p159_p3), %490, %v216_v5  }
   0xe   : > { %s609_s12 = smov (!%p191_p4, %s507_s12), 1 }
   0xf   : > { %s460_s20 = sshll.u32 %s609_s12, 3  ;;  %s461_s9 = sshll.u32 %s609_s12, 6 }
  0x10   : > { %s198_s27 = scalar_lea.vmem %s600_s0, %s460_s20  ;;  %s208_s16 = scalar_lea.vmem %s603_s3, %s461_s9 }
  0x11   : > { %v210_v6 = vld [vmem:[%s198_s27] sm:$0xff] }
  0x12   : > { %v240_v7 = vcombine.high %v210_v6, %v210_v6 }
  0x14   : > { %452 = vmatprep.subr.msk.mxu0 %vm254_vm0, %v240_v7  ;;  %462 = vmatprep.subr.msk.mxu1 %vm254_vm0, %v240_v7 }
  0x15   : > { %453 = vmatpush1.msk.msra.mxu0 %vm254_vm0, %v210_v6  ;;  %463 = vmatpush1.msk.msra.mxu1 %vm254_vm0, %v210_v6 }
  0x16   : > { %454 = vmatmul.mubr.msk.f32.vlgmr.msra.gmra.mrb[0].mxu0 %vm241_vm1, %v211_v8  ;;  %456 = vmatmul.mubr.msk.f32.vlgmr.msra.gmra.mrb[0].mxu1 %vm241_vm1, %v213_v9 }
  0x17   : > { %329 = vmatprep.mubr.f32.mxu0 %v517_v0  ;;  %341 = vmatprep.mubr.f32.mxu1 %v517_v0 }
  0x1a   : > { %455 = vmatmul.mubr.msk.f32.gmra.mrb[2].mxu0 %vm241_vm1, %v212_v10  ;;  %457 = vmatmul.mubr.msk.f32.gmra.mrb[2].mxu1 %vm241_vm1, %v214_v11 }
  0x88   : > { %v232_v12 = vpop.permute.xlu1 %231  ;;  %v222_v13 = vpop.permute.xlu0 %221 }
  0x8c   : > { %v237_v22 = vpop.permute.xlu1 %236  ;;  %v227_v23 = vpop.permute.xlu0 %226 }
  0xe9   : > { %v325_v14 = vpop.f32.mrb[0].mxu0  ;;  %v337_v15 = vpop.f32.mrb[0].mxu1 }
  0xea   : > { %v326_v16 = vadd.f32 %v325_v14, %v222_v13  ;;  %v338_v17 = vadd.f32 %v337_v15, %v232_v12  ;;  %v327_v18 = vpop.f32.mrb[1].mxu0  ;;  %v339_v19 = vpop.f32.mrb[1].mxu1 }
  0xeb   : > { %v328_v20 = vadd.f32 %v327_v18, %v222_v13  ;;  %v340_v21 = vadd.f32 %v339_v19, %v232_v12 }
  0xec   : > { %348 = vst [vmem:[%s208_s16] sm:$0xff] %v326_v16  ;;  %352 = vst [vmem:[%s208_s16 + $0x20] sm:$0xff] %v338_v17 }
  0xed   : > { %349 = vst [vmem:[%s208_s16 + $0x8] sm:$0xff] %v328_v20  ;;  %353 = vst [vmem:[%s208_s16 + $0x28] sm:$0xff] %v340_v21  ;;  %v331_v24 = vpop.f32.mrb[2].mxu0  ;;  %v343_v25 = vpop.f32.mrb[2].mxu1 }
  0xee   : > { %v332_v26 = vadd.f32 %v331_v24, %v227_v23  ;;  %v344_v27 = vadd.f32 %v343_v25, %v237_v22  ;;  %v333_v28 = vpop.f32.mrb[3].mxu0  ;;  %v345_v29 = vpop.f32.mrb[3].mxu1 }
  0xef   : > { %v334_v30 = vadd.f32 %v333_v28, %v227_v23  ;;  %v346_v31 = vadd.f32 %v345_v29, %v237_v22 }
  0xf0   : > { %350 = vst [vmem:[%s208_s16 + $0x10] sm:$0xff] %v332_v26  ;;  %354 = vst [vmem:[%s208_s16 + $0x30] sm:$0xff] %v344_v27 }
  0xf1   : > { %351 = vst [vmem:[%s208_s16 + $0x18] sm:$0xff] %v334_v30  ;;  %355 = vst [vmem:[%s208_s16 + $0x38] sm:$0xff] %v346_v31 }
  0xf2 PF: > { %s13_s14 = sadd.s32 1, %s515_s14   ;;  %s604_s12 = smov %s511_s13 }
  0xf3   : > { %p10_p5 = scmp.ge.s32.totalorder %s13_s14, 4   ;;  %s605_s13 = smov %s607_s15 }
  0xf5   :  { %12 = sbr.rel (!%p10_p5) target bundleno = 2 (0x2), region = 62 }

</bundles_post_ra>
